<compile_context>
chip_gen: v7x
topology: tpu7x:2x2x1
jax: 0.10.0
libtpu: 0.0.40
codegen_flags: <defaults>
</compile_context>

<pallas_src>
import functools

import jax
import jax.numpy as jnp
from jax.experimental import pallas as pl
from jax.experimental.pallas import tpu as pltpu

NUM_RESOLUTIONS = 4
NUM_RES_BLOCKS = 2
ACT_DTYPE = jnp.bfloat16


def _vmem_limit():
    # Generation-aware cap: ~96 MiB on 128 MiB parts (v5e/v6e), 3/4 of VMEM on
    # smaller parts (v7x: 64 MiB/TC -> 48 MiB).
    try:
        cap = pltpu.get_tpu_info().vmem_capacity_bytes
    except Exception:
        cap = 64 * 1024 * 1024
    return int(min(96 * 1024 * 1024, cap * 3 // 4))


VMEM_LIMIT = _vmem_limit()


def _pick(d, cands):
    for c in cands:
        if d % c == 0:
            return c
    return d


# ----------------------- matmul + bias : 1x1 convs ---------------------------
def _matmul_bias_kernel(a_ref, w_ref, bias_ref, o_ref, acc_ref):
    k = pl.program_id(2)

    @pl.when(k == 0)
    def _():
        acc_ref[...] = jnp.zeros_like(acc_ref)

    acc_ref[...] += jnp.dot(a_ref[...], w_ref[...],
                            preferred_element_type=jnp.float32)

    @pl.when(k == pl.num_programs(2) - 1)
    def _():
        o_ref[...] = (acc_ref[...] + bias_ref[...]).astype(o_ref.dtype)


@functools.lru_cache(maxsize=None)
def _matmul_bias_fn(M, K, N):
    # Prefer 256-wide tiles so every call has >=2 parallel grid steps (v7x
    # megacore) while keeping stores lane-dense.
    tm = _pick(M, (256, 512, 128, 64, 32, 16, 8))
    tn = _pick(N, (256, 512, 128))
    tk = K if K <= 2048 else _pick(K, (2048, 1024, 512, 256))
    grid = (M // tm, N // tn, K // tk)
    f = pl.pallas_call(
        _matmul_bias_kernel,
        out_shape=jax.ShapeDtypeStruct((M, N), ACT_DTYPE),
        grid_spec=pltpu.PrefetchScalarGridSpec(
            num_scalar_prefetch=0,
            grid=grid,
            in_specs=[
                pl.BlockSpec((tm, tk), lambda i, j, k: (i, k)),
                pl.BlockSpec((tk, tn), lambda i, j, k: (k, j)),
                pl.BlockSpec((1, tn), lambda i, j, k: (0, j)),
            ],
            out_specs=pl.BlockSpec((tm, tn), lambda i, j, k: (i, j)),
            scratch_shapes=[pltpu.VMEM((tm, tn), jnp.float32)],
        ),
        compiler_params=pltpu.CompilerParams(
            dimension_semantics=("parallel", "parallel", "arbitrary"),
            vmem_limit_bytes=VMEM_LIMIT),
    )
    return jax.jit(f)


def matmul_bias(a, w, b):
    M, K = a.shape
    N = w.shape[1]
    return _matmul_bias_fn(M, K, N)(a, w, b)


def conv2d_1x1(x, p):
    B, H, W, C = x.shape
    y = matmul_bias(x.reshape(B * H * W, C), p["w"], p["b"])
    return y.reshape(B, H, W, -1)


# ------------------------ direct 3x3 conv (no im2col) ------------------------
# Input is the width-unfolded padded activation (B, (H+2)*W, 3*Cin): the 3 dx
# taps are stacked along channels in the wrapper, so each dy needs exactly ONE
# contiguous (rpt*W, 3*Cin) load (sublane-aligned since W % 8 == 0) and ONE MXU
# matmul with K = 3*Cin.  Bias + optional residual are fused in the epilogue.
def _conv3x3_kernel(x_ref, w_ref, b_ref, *rest, W, rpt, has_res):
    if has_res:
        r_ref, o_ref = rest
    else:
        (o_ref,) = rest
        r_ref = None
    i = pl.program_id(2)
    row0 = i * rpt
    tn = o_ref.shape[-1]
    m = rpt * W
    acc = None
    for dy in range(3):
        start = (row0 + dy) * W
        if W % 8 == 0:
            start = pl.multiple_of(start, 8)
        lhs = x_ref[0, pl.ds(start, m), :]                # (rpt*W, 3*Cin) bf16
        part = jnp.dot(lhs, w_ref[dy], preferred_element_type=jnp.float32)
        acc = part if acc is None else acc + part
    y = (acc + b_ref[...]).reshape(rpt, W, tn)
    if r_ref is not None:
        y = y + r_ref[0].astype(jnp.float32)
    o_ref[0] = y.astype(o_ref.dtype)


def _pick_rpt(H, W):
    cap = max(1, 256 // W)            # target ~256 rows of matmul M per dy
    for r in range(min(cap, H), 0, -1):
        if H % r == 0:
            return r
    return 1


@functools.lru_cache(maxsize=None)
def _conv3x3_fn(B, H, W, Cin, Cout, has_res):
    K3 = 3 * Cin
    Nrows = (H + 2) * W
    rpt = _pick_rpt(H, W)
    tn = _pick(Cout, (256, 512, 128))   # 256 first: >=2 channel steps at C=512
    grid = (B, Cout // tn, H // rpt)
    kern = functools.partial(_conv3x3_kernel, W=W, rpt=rpt, has_res=has_res)
    # TODO(synk): for realistic latent sizes, window the activation over rows
    # (index_map over i) and single-buffer it instead of keeping the whole
    # slab resident, so it stays within v7x's 64 MiB VMEM.
    in_specs = [
        pl.BlockSpec((1, Nrows, K3), lambda b, j, i: (b, 0, 0)),   # resident
        pl.BlockSpec((3, K3, tn), lambda b, j, i: (0, 0, j)),
        pl.BlockSpec((1, tn), lambda b, j, i: (0, j)),
    ]
    if has_res:
        in_specs.append(
            pl.BlockSpec((1, rpt, W, tn), lambda b, j, i: (b, i, 0, j)))
    f = pl.pallas_call(
        kern,
        out_shape=jax.ShapeDtypeStruct((B, H, W, Cout), ACT_DTYPE),
        grid_spec=pltpu.PrefetchScalarGridSpec(
            num_scalar_prefetch=0,
            grid=grid,
            in_specs=in_specs,
            out_specs=pl.BlockSpec((1, rpt, W, tn),
                                   lambda b, j, i: (b, i, 0, j)),
        ),
        compiler_params=pltpu.CompilerParams(
            dimension_semantics=("parallel", "parallel", "parallel"),
            vmem_limit_bytes=VMEM_LIMIT),
    )
    return jax.jit(f)


def conv2d_3x3(x, p, residual=None):
    B, H, W, Cin = x.shape
    Cout = p["w"].shape[-1]
    xp = jnp.pad(x, ((0, 0), (1, 1), (1, 1), (0, 0)))    # (B, H+2, W+2, Cin)
    # Width-unfold (dx -> channels): x3[..., w, dx*Cin:(dx+1)*Cin] = xp[..., w+dx, :]
    x3 = jnp.concatenate([xp[:, :, 0:W, :], xp[:, :, 1:W + 1, :],
                          xp[:, :, 2:W + 2, :]], axis=-1)
    x3 = x3.reshape(B, (H + 2) * W, 3 * Cin)
    fn = _conv3x3_fn(B, H, W, Cin, Cout, residual is not None)
    if residual is None:
        return fn(x3, p["w"], p["b"])
    return fn(x3, p["w"], p["b"], residual)


# ---------------------- GroupNorm(32) fused with swish -----------------------
def _groupnorm_kernel(x_ref, memb_ref, membT_ref, g_ref, b_ref, o_ref, *,
                      n, eps, swish):
    x = x_ref[0].astype(jnp.float32)    # (HW, Cblk)
    memb = memb_ref[...]                # (Cblk, Gblk) one-hot group membership
    membT = membT_ref[...]              # (Gblk, Cblk)
    xg = jnp.dot(x, memb, preferred_element_type=jnp.float32)       # (HW, G)
    x2g = jnp.dot(x * x, memb, preferred_element_type=jnp.float32)  # (HW, G)
    mean_g = jnp.sum(xg, axis=0, keepdims=True) / n                 # (1, G)
    var_g = jnp.sum(x2g, axis=0, keepdims=True) / n - mean_g * mean_g
    var_g = jnp.maximum(var_g, 0.0)     # guard E[x^2]-E[x]^2 cancellation
    inv_g = jax.lax.rsqrt(var_g + eps)
    mean_c = jnp.dot(mean_g, membT, preferred_element_type=jnp.float32)
    inv_c = jnp.dot(inv_g, membT, preferred_element_type=jnp.float32)
    y = (x - mean_c) * inv_c * g_ref[...] + b_ref[...]
    if swish:
        y = y * jax.nn.sigmoid(y)
    o_ref[0] = y.astype(o_ref.dtype)


@functools.lru_cache(maxsize=None)
def _groupnorm_fn(B, HW, C, cblk, gblk, cg, swish, eps=1e-6):
    # TODO(synk): tile the stats over HW (two-pass) for realistic latent sizes.
    n = float(HW * cg)
    nblk = C // cblk
    kern = functools.partial(_groupnorm_kernel, n=n, eps=eps, swish=swish)
    f = pl.pallas_call(
        kern,
        out_shape=jax.ShapeDtypeStruct((B, HW, C), ACT_DTYPE),
        grid_spec=pltpu.PrefetchScalarGridSpec(
            num_scalar_prefetch=0,
            grid=(B, nblk),
            in_specs=[
                pl.BlockSpec((1, HW, cblk), lambda b, c: (b, 0, c)),
                pl.BlockSpec((cblk, gblk), lambda b, c: (0, 0)),
                pl.BlockSpec((gblk, cblk), lambda b, c: (0, 0)),
                pl.BlockSpec((1, cblk), lambda b, c: (0, c)),
                pl.BlockSpec((1, cblk), lambda b, c: (0, c)),
            ],
            out_specs=pl.BlockSpec((1, HW, cblk), lambda b, c: (b, 0, c)),
        ),
        compiler_params=pltpu.CompilerParams(
            dimension_semantics=("parallel", "parallel"),
            vmem_limit_bytes=VMEM_LIMIT),
    )
    return jax.jit(f)


def groupnorm(x_nhwc, p, swish=False, groups=32):
    B, H, W, C = x_nhwc.shape
    cg = C // groups
    # >=2 channel blocks on wide layers so v7x's second TensorCore gets work;
    # blocks stay >=128 lanes and aligned to group boundaries.
    cblk = C if C <= 128 else C // 2
    gblk = cblk // cg
    memb = (jnp.arange(cblk)[:, None] // cg ==
            jnp.arange(gblk)[None, :]).astype(jnp.float32)
    y = _groupnorm_fn(B, H * W, C, cblk, gblk, cg, swish)(
        x_nhwc.reshape(B, H * W, C), memb, memb.T, p["gamma"], p["beta"])
    return y.reshape(B, H, W, C)


# ------------------- fused mid attention block (single head) -----------------
def _attn_block_kernel(h_ref, x_ref, qkvw_ref, qkvb_ref, pw_ref, pb_ref, o_ref,
                       *, C, scale):
    h = h_ref[0]                                            # (HW, C) bf16
    qkv = (jnp.dot(h, qkvw_ref[...], preferred_element_type=jnp.float32)
           + qkvb_ref[...])                                 # (HW, 3C) f32
    q = qkv[:, :C].astype(ACT_DTYPE)
    k = qkv[:, C:2 * C].astype(ACT_DTYPE)
    v = qkv[:, 2 * C:].astype(ACT_DTYPE)
    s = jax.lax.dot_general(q, k, (((1,), (1,)), ((), ())),
                            preferred_element_type=jnp.float32) * scale
    s = s - jnp.max(s, axis=-1, keepdims=True)
    p = jnp.exp(s)
    p = p * pl.reciprocal(jnp.sum(p, axis=-1, keepdims=True), approx=True)
    a = jnp.dot(p.astype(ACT_DTYPE), v, preferred_element_type=jnp.float32)
    o = (jnp.dot(a.astype(ACT_DTYPE), pw_ref[...],
                 preferred_element_type=jnp.float32)
         + pb_ref[...] + x_ref[0].astype(jnp.float32))      # +x residual fused
    o_ref[0] = o.astype(o_ref.dtype)


@functools.lru_cache(maxsize=None)
def _attn_block_fn(B, HW, C):
    # TODO(synk): flash-style KV tiling for large HW; mid-block HW is tiny here.
    kern = functools.partial(_attn_block_kernel, C=C, scale=float(C) ** -0.5)
    act = lambda: pl.BlockSpec((1, HW, C), lambda b: (b, 0, 0))
    f = pl.pallas_call(
        kern,
        out_shape=jax.ShapeDtypeStruct((B, HW, C), ACT_DTYPE),
        grid_spec=pltpu.PrefetchScalarGridSpec(
            num_scalar_prefetch=0, grid=(B,),
            in_specs=[act(), act(),
                      pl.BlockSpec((C, 3 * C), lambda b: (0, 0)),
                      pl.BlockSpec((1, 3 * C), lambda b: (0, 0)),
                      pl.BlockSpec((C, C), lambda b: (0, 0)),
                      pl.BlockSpec((1, C), lambda b: (0, 0))],
            out_specs=act()),
        compiler_params=pltpu.CompilerParams(
            dimension_semantics=("parallel",),
            vmem_limit_bytes=VMEM_LIMIT),
    )
    return jax.jit(f)


# ------------------------------ decoder blocks -------------------------------
def resnet_block(x, p):
    h = groupnorm(x, p["norm1"], swish=True)
    h = conv2d_3x3(h, p["conv1"])
    h = groupnorm(h, p["norm2"], swish=True)
    # dropout(p=0.0) -> identity
    res = conv2d_1x1(x, p["nin_shortcut"]) if "nin_shortcut" in p else x
    return conv2d_3x3(h, p["conv2"], residual=res)      # residual fused


def attn_block(x, p):
    B, H, W, C = x.shape
    HW = H * W
    h = groupnorm(x, p["norm"], swish=False)
    o = _attn_block_fn(B, HW, C)(
        h.reshape(B, HW, C), x.reshape(B, HW, C),
        p["qkv_w"], p["qkv_b"], p["proj_w"], p["proj_b"])
    return o.reshape(B, H, W, C)


def upsample(x, p):
    # TODO(synk): fuse the nearest-2x upsample into the conv kernel's index
    # math (read the pre-upsample slab with //2 rows/cols) to avoid
    # materializing the 4x tensor; the bf16 repeat fuses under jit for now.
    x = jnp.repeat(jnp.repeat(x, 2, axis=1), 2, axis=2)  # nearest, scale=2
    return conv2d_3x3(x, p["conv"])


def decoder_forward(z, P):
    h = conv2d_3x3(z, P["conv_in"])
    h = resnet_block(h, P["mid_block_1"])
    h = attn_block(h, P["mid_attn_1"])
    h = resnet_block(h, P["mid_block_2"])
    for i_level in reversed(range(NUM_RESOLUTIONS)):
        lvl = P["up"][i_level]
        for i_block in range(NUM_RES_BLOCKS + 1):
            h = resnet_block(h, lvl["block"][i_block])
        if i_level != 0:
            h = upsample(h, lvl["upsample"])
    h = groupnorm(h, P["norm_out"], swish=True)
    h = conv2d_3x3(h, P["conv_out"])[..., :3]   # channel-padded conv, slice 3
    return h


@jax.jit
def autoencoder_kl_forward(z_nchw, P):
    # forward(z) == decode(z) == decoder(post_quant_conv(z))
    z = jnp.transpose(z_nchw, (0, 2, 3, 1))               # NCHW -> NHWC (f32)
    # post_quant_conv is a 4->4 channel 1x1 conv: far too small for the MXU,
    # so run it as a plain XLA einsum instead of a pallas_call.
    pq = P["post_quant_conv"]
    z = (jnp.einsum("bhwc,cd->bhwd", z, pq["w"].astype(jnp.float32))
         + pq["b"]).astype(ACT_DTYPE)
    h = decoder_forward(z, P)
    return jnp.transpose(h, (0, 3, 1, 2)).astype(jnp.float32)  # NHWC -> NCHW


# ---------------------------- synthetic parameters ---------------------------
def build_params(key):
    keys = iter(jax.random.split(key, 512))

    def conv1x1(cin, cout):
        w = jax.random.normal(next(keys), (cin, cout), jnp.float32) * 0.02
        return {"w": w.astype(ACT_DTYPE), "b": jnp.zeros((1, cout), jnp.float32)}

    def conv3x3p(cin, cout, cout_pad=None):
        cp = cout if cout_pad is None else cout_pad
        w = jax.random.normal(next(keys), (9, cin, cout), jnp.float32) * 0.02
        if cp != cout:
            w = jnp.pad(w, ((0, 0), (0, 0), (0, cp - cout)))
        # (9, Cin, Cout) tap-major (t = dy*3+dx) -> (3, 3*Cin, Cout): per dy the
        # 3 dx taps stack along Cin, matching the width-unfolded input layout.
        w = w.reshape(3, 3 * cin, cp)
        return {"w": w.astype(ACT_DTYPE), "b": jnp.zeros((1, cp), jnp.float32)}

    def gn(c):
        return {"gamma": jnp.ones((1, c), jnp.float32),
                "beta": jnp.zeros((1, c), jnp.float32)}

    def resblock(cin, cout):
        p = {"norm1": gn(cin), "conv1": conv3x3p(cin, cout),
             "norm2": gn(cout), "conv2": conv3x3p(cout, cout)}
        if cin != cout:
            p["nin_shortcut"] = conv1x1(cin, cout)
        return p

    def attnblock(c):
        wq = jax.random.normal(next(keys), (c, c), jnp.float32) * 0.02
        wk = jax.random.normal(next(keys), (c, c), jnp.float32) * 0.02
        wv = jax.random.normal(next(keys), (c, c), jnp.float32) * 0.02
        wo = jax.random.normal(next(keys), (c, c), jnp.float32) * 0.02
        return {"norm": gn(c),
                "qkv_w": jnp.concatenate([wq, wk, wv], axis=1).astype(ACT_DTYPE),
                "qkv_b": jnp.zeros((1, 3 * c), jnp.float32),
                "proj_w": wo.astype(ACT_DTYPE),
                "proj_b": jnp.zeros((1, c), jnp.float32)}

    ch, ch_mult, z_ch, out_ch, embed_dim = 128, (1, 2, 4, 4), 4, 3, 4
    P = {}
    # quant_conv exists in __init__ but is unused by forward() (decode path).
    P["post_quant_conv"] = conv1x1(embed_dim, z_ch)
    block_in = ch * ch_mult[-1]                       # 512
    P["conv_in"] = conv3x3p(z_ch, block_in)
    P["mid_block_1"] = resblock(block_in, block_in)
    P["mid_attn_1"] = attnblock(block_in)
    P["mid_block_2"] = resblock(block_in, block_in)
    up = [None] * NUM_RESOLUTIONS
    for i_level in reversed(range(NUM_RESOLUTIONS)):
        block_out = ch * ch_mult[i_level]
        blocks = []
        for _ in range(NUM_RES_BLOCKS + 1):
            blocks.append(resblock(block_in, block_out))
            block_in = block_out
        lvl = {"block": blocks}
        if i_level != 0:
            lvl["upsample"] = {"conv": conv3x3p(block_in, block_in)}
        up[i_level] = lvl
    P["up"] = up
    P["norm_out"] = gn(block_in)                      # 128 channels
    P["conv_out"] = conv3x3p(block_in, out_ch, cout_pad=128)
    return P


if __name__ == "__main__":
    root = jax.random.PRNGKey(0)
    pkey, zkey = jax.random.split(root)
    params = build_params(pkey)
    # z: latent in PyTorch NCHW layout (B, embed_dim=4, h, w) -> output (B, 3, 8h, 8w)
    z = jax.random.normal(zkey, (1, 4, 8, 8), jnp.float32)
    out = autoencoder_kl_forward(z, params)
    out = jax.block_until_ready(out)
    assert out.shape == (1, 3, 64, 64), out.shape
    assert bool(jnp.all(jnp.isfinite(out)))
    print("KERNEL_OK")
</pallas_src>

<mosaic_0001>
module attributes {stable_mosaic.version = 11 : i64} {
  func.func @_conv3x3_kernel(%arg0: i32, %arg1: i32, %arg2: i32, %arg3: memref<1x80x12xbf16, #tpu.memory_space<vmem>>, %arg4: memref<3x12x256xbf16, #tpu.memory_space<vmem>>, %arg5: memref<1x256xf32, #tpu.memory_space<vmem>>, %arg6: memref<1x8x8x256xbf16, #tpu.memory_space<vmem>>) attributes {dimension_semantics = [#tpu.dimension_semantics<parallel>, #tpu.dimension_semantics<parallel>, #tpu.dimension_semantics<parallel>], iteration_bounds = array<i64: 1, 2, 1>, scalar_prefetch = 0 : i64, scratch_operands = 0 : i64, tpu.core_type = #tpu.core_type<tc>, window_params = [{transform_indices = @transform_0, window_bounds = array<i64: 1, 80, 12>}, {transform_indices = @transform_1, window_bounds = array<i64: 3, 12, 256>}, {transform_indices = @transform_2, window_bounds = array<i64: 1, 256>}, {transform_indices = @transform_3, window_bounds = array<i64: 1, 8, 8, 256>}]} {
    %c8_i32 = arith.constant 8 : i32
    %0 = arith.muli %arg2, %c8_i32 : i32
    %c0_i32 = arith.constant 0 : i32
    %1 = arith.addi %0, %c0_i32 : i32
    %c8_i32_0 = arith.constant 8 : i32
    %2 = arith.muli %1, %c8_i32_0 : i32
    %3 = tpu.assume_multiple %2, 8 : i32
    %c0 = arith.constant 0 : index
    %4 = arith.index_cast %3 : i32 to index
    %c0_1 = arith.constant 0 : index
    %5 = vector.load %arg3[%c0, %4, %c0_1] : memref<1x80x12xbf16, #tpu.memory_space<vmem>>, vector<1x64x12xbf16>
    %6 = vector.shape_cast %5 : vector<1x64x12xbf16> to vector<64x12xbf16>
    %c0_2 = arith.constant 0 : index
    %c0_3 = arith.constant 0 : index
    %c0_4 = arith.constant 0 : index
    %7 = vector.load %arg4[%c0_2, %c0_3, %c0_4] : memref<3x12x256xbf16, #tpu.memory_space<vmem>>, vector<1x12x256xbf16>
    %8 = vector.shape_cast %7 : vector<1x12x256xbf16> to vector<12x256xbf16>
    %cst = arith.constant dense<0.000000e+00> : vector<64x256xf32>
    %9 = tpu.matmul %6, %8, %cst {dimension_numbers = #tpu.dot_dimension_numbers<[1], [0], [0], [1], [0, 0, 1, 1], [], []>} : vector<64x12xbf16>, vector<12x256xbf16>, vector<64x256xf32> -> vector<64x256xf32>
    %c1_i32 = arith.constant 1 : i32
    %10 = arith.addi %0, %c1_i32 : i32
    %c8_i32_5 = arith.constant 8 : i32
    %11 = arith.muli %10, %c8_i32_5 : i32
    %12 = tpu.assume_multiple %11, 8 : i32
    %c0_6 = arith.constant 0 : index
    %13 = arith.index_cast %12 : i32 to index
    %c0_7 = arith.constant 0 : index
    %14 = vector.load %arg3[%c0_6, %13, %c0_7] : memref<1x80x12xbf16, #tpu.memory_space<vmem>>, vector<1x64x12xbf16>
    %15 = vector.shape_cast %14 : vector<1x64x12xbf16> to vector<64x12xbf16>
    %c1 = arith.constant 1 : index
    %c0_8 = arith.constant 0 : index
    %c0_9 = arith.constant 0 : index
    %16 = vector.load %arg4[%c1, %c0_8, %c0_9] : memref<3x12x256xbf16, #tpu.memory_space<vmem>>, vector<1x12x256xbf16>
    %17 = vector.shape_cast %16 : vector<1x12x256xbf16> to vector<12x256xbf16>
    %cst_10 = arith.constant dense<0.000000e+00> : vector<64x256xf32>
    %18 = tpu.matmul %15, %17, %cst_10 {dimension_numbers = #tpu.dot_dimension_numbers<[1], [0], [0], [1], [0, 0, 1, 1], [], []>} : vector<64x12xbf16>, vector<12x256xbf16>, vector<64x256xf32> -> vector<64x256xf32>
    %19 = arith.addf %9, %18 : vector<64x256xf32>
    %c2_i32 = arith.constant 2 : i32
    %20 = arith.addi %0, %c2_i32 : i32
    %c8_i32_11 = arith.constant 8 : i32
    %21 = arith.muli %20, %c8_i32_11 : i32
    %22 = tpu.assume_multiple %21, 8 : i32
    %c0_12 = arith.constant 0 : index
    %23 = arith.index_cast %22 : i32 to index
    %c0_13 = arith.constant 0 : index
    %24 = vector.load %arg3[%c0_12, %23, %c0_13] : memref<1x80x12xbf16, #tpu.memory_space<vmem>>, vector<1x64x12xbf16>
    %25 = vector.shape_cast %24 : vector<1x64x12xbf16> to vector<64x12xbf16>
    %c2 = arith.constant 2 : index
    %c0_14 = arith.constant 0 : index
    %c0_15 = arith.constant 0 : index
    %26 = vector.load %arg4[%c2, %c0_14, %c0_15] : memref<3x12x256xbf16, #tpu.memory_space<vmem>>, vector<1x12x256xbf16>
    %27 = vector.shape_cast %26 : vector<1x12x256xbf16> to vector<12x256xbf16>
    %cst_16 = arith.constant dense<0.000000e+00> : vector<64x256xf32>
    %28 = tpu.matmul %25, %27, %cst_16 {dimension_numbers = #tpu.dot_dimension_numbers<[1], [0], [0], [1], [0, 0, 1, 1], [], []>} : vector<64x12xbf16>, vector<12x256xbf16>, vector<64x256xf32> -> vector<64x256xf32>
    %29 = arith.addf %19, %28 : vector<64x256xf32>
    %c0_17 = arith.constant 0 : index
    %c0_18 = arith.constant 0 : index
    %30 = vector.load %arg5[%c0_17, %c0_18] : memref<1x256xf32, #tpu.memory_space<vmem>>, vector<1x256xf32>
    %31 = vector.broadcast %30 : vector<1x256xf32> to vector<64x256xf32>
    %32 = arith.addf %29, %31 : vector<64x256xf32>
    %33 = vector.shape_cast %32 : vector<64x256xf32> to vector<8x8x256xf32>
    %34 = arith.truncf %33 : vector<8x8x256xf32> to vector<8x8x256xbf16>
    %c0_19 = arith.constant 0 : index
    %c0_20 = arith.constant 0 : index
    %c0_21 = arith.constant 0 : index
    %c0_22 = arith.constant 0 : index
    %35 = vector.load %arg6[%c0_19, %c0_20, %c0_21, %c0_22] : memref<1x8x8x256xbf16, #tpu.memory_space<vmem>>, vector<1x8x8x256xbf16>
    %36 = vector.shape_cast %35 : vector<1x8x8x256xbf16> to vector<8x8x256xbf16>
    %37 = vector.shape_cast %34 : vector<8x8x256xbf16> to vector<1x8x8x256xbf16>
    tpu.vector_store %arg6[%c0_19, %c0_20, %c0_21, %c0_22], %37 {strides = array<i32>} : memref<1x8x8x256xbf16, #tpu.memory_space<vmem>>, vector<1x8x8x256xbf16>,
    return
  }
  func.func @transform_0(%arg0: i32, %arg1: i32, %arg2: i32) -> (i32, i32, i32) {
    %c0_i32 = arith.constant 0 : i32
    %c0_i32_0 = arith.constant 0 : i32
    %c0_i32_1 = arith.constant 0 : i32
    return %arg0, %c0_i32, %c0_i32_0 : i32, i32, i32
  }
  func.func @transform_1(%arg0: i32, %arg1: i32, %arg2: i32) -> (i32, i32, i32) {
    %c0_i32 = arith.constant 0 : i32
    %c0_i32_0 = arith.constant 0 : i32
    %c0_i32_1 = arith.constant 0 : i32
    return %c0_i32, %c0_i32_0, %arg1 : i32, i32, i32
  }
  func.func @transform_2(%arg0: i32, %arg1: i32, %arg2: i32) -> (i32, i32) {
    %c0_i32 = arith.constant 0 : i32
    %c0_i32_0 = arith.constant 0 : i32
    return %c0_i32, %arg1 : i32, i32
  }
  func.func @transform_3(%arg0: i32, %arg1: i32, %arg2: i32) -> (i32, i32, i32, i32) {
    %c0_i32 = arith.constant 0 : i32
    %c0_i32_0 = arith.constant 0 : i32
    return %arg0, %arg2, %c0_i32, %arg1 : i32, i32, i32, i32
  }
}

</mosaic_0001>

<bundles_post_ra>
// kernel: tpu_custom_call.1
= control target key start
LH: loop header
LB: loop body
LE: loop exit
PB: predicated region body
PF: predicated region fallthrough
CT: control target
= control target key end

     0   :  { %8 = vsyncpa [#allocation3], 0  ;;  %s1537_s0 = inlined_call_operand.vmem [shape: bf16[1,80,12], index: 0, kind: input, shape index: {}]   ;;  %s1538_s1 = inlined_call_operand.hbm [shape: bf16[3,12,512], index: 1, kind: input, shape index: {}]   ;;  %s1539_s2 = inlined_call_operand.vmem [shape: f32[1,512], index: 2, kind: input, shape index: {}]   ;;  %s1540_s3 = inlined_call_operand.hbm [shape: bf16[1,8,8,512], index: 3, kind: output, shape index: {}]  }
   0x1   :  { %10 = vsyncpa [#allocation3 + $0x1], 0 }
   0x2   :  { %11 = vsyncpa [#allocation4], 0 }
   0x3   :  { %13 = vsyncpa [#allocation4 + $0x1], 0  ;;  %s1273_s12 = smov 0   ;;  %s1275_s13 = smov 0  }
   0x4   :  { %s1277_s14 = smov 0   ;;  %s1279_s15 = smov 0  }
   0x5   :  { %s1281_s16 = smov 0   ;;  %s1283_s17 = smov 0  }
   0x6 LB: > { %s918_s18 = sadd.s32 4294967295, %s1242_s17   ;;  %s919_s19 = sadd.s32 4294967294, %s1242_s17   ;;  %s1242_s17 = sphi %s1283_s17, %s19_s17   ;;  %s1238_s16 = sphi %s1281_s16, %s1554_s16   ;;  %s1234_s15 = sphi %s1279_s15, %s1553_s15   ;;  %s1230_s14 = sphi %s1277_s14, %s1552_s14   ;;  %s1226_s13 = sphi %s1275_s13, %s1551_s13   ;;  %s1222_s12 = sphi %s1273_s12, %s1550_s12  }
   0x7   : > { %s34_s20 = sadd.s32 1, %s1238_s16  ;;  %s71_s21 = sadd.s32 1, %s1230_s14 }
   0x8   : > { %p36_p0 = scmp.ge.s32.totalorder %s34_s20, 2  ;;  %p78_p1 = scmp.ne.s32.totalorder %s1230_s14, %s1226_s13 }
   0x9   : > { %p79_p2 = scmp.eq.s32.totalorder %s1242_s17, 0  ;;  %p84_p3 = scmp.ne.s32.totalorder %s1226_s13, %s1222_s12 }
   0xa   : > { %s1556_s20 = smov (%p36_p0, %s34_s20), 0  ;;  %p85_p5 = scmp.eq.s32.totalorder %s918_s18, 0 }
   0xb   : > { %p1314_p4 = por %p79_p2, %p78_p1  ;;  %s68_s23 = ssub.s32 %s1238_s16, %s1556_s20 }
   0xc   : > { %p138_p6 = scmp.eq.s32.totalorder %s918_s18, 1  ;;  %p69_p7 = scmp.eq.s32.totalorder %s68_s23, 0 }
   0xd   : > { %p1320_p8 = por %p85_p5, %p84_p3  ;;  %p144_p10 = scmp.eq.s32.totalorder %s919_s19, 1 }
   0xe   : > { %p1324_p9 = por %p138_p6, %p78_p1  ;;  %p1052_p13 = scmp.lt.s32.totalorder %s1242_s17, 2 }
   0xf   : > { %s1329_s26 = scalar_select %p69_p7, %s1230_s14, %s71_s21  }
  0x10   : > { %s1544_s25 = scalar_select %p1324_p9, 1, 0 }
  0x11   : > { %p1331_p11 = por %p144_p10, %p84_p3  ;;  %s172_s28 = sand.u32 1, %s1230_s14  }
  0x12   : > { %s1038_s29 = smul.u32 48, %s172_s28  ;;  %s994_s30 = sshll.u32 %s1238_s16, 7 }
  0x13   : > { %s1545_s27 = scalar_select %p1331_p11, 1, 0 }
  0x14   : > { %p1341_p0 = pnand %p1052_p13, %p1314_p4  ;;  %s1348_s7 = scalar_lea.hbm %s1538_s1, %s994_s30 }
  0x15   : > { %s176_s8 = scalar_lea.vmem [#allocation2], %s1038_s29  ;;  %s1352_s10 = scalar_lea.sflag [#allocation3], %s172_s28 }
  0x16   : > { %s183_s9 = sshll.u32 %s176_s8, 4  ;;  %s1130_s11 = scalar_lea.hbm %s1348_s7, 768  ;;  %s1350_s9 = int_to_ptr.vmem [resolvable:$true] %s183_s9 }
  0x17   : > { %p1131_p1 = scmp.ne.s32.totalorder %s1348_s7, %s1130_s11  ;;  %p1132_p2 = pneg %p1341_p0 }
  0x18   : > { %s1135_s21 = scalar_lea.hbm %s1538_s1, 1536  ;;  %p1136_p5 = scmp.lt.u32.totalorder %s1348_s7, %s1538_s1 }
  0x19   : > { %p1133_p3 = pnand %p1132_p2, %p1131_p1  ;;  %p1137_p6 = scmp.lt.u32.totalorder %s1135_s21, %s1130_s11 }
  0x1a   : > { %p1139_p10 = scmp.lt.u32.totalorder %s1130_s11, %s1348_s7 }
  0x1b   : > { %p1134_p4 = pneg %p1133_p3  ;;  %p1138_p7 = por %p1137_p6, %p1136_p5 }
  0x1d   : > { %p1140_p13 = por %p1139_p10, %p1138_p7 }
  0x1f   : > { %p1141_p12 = pnand %p1140_p13, %p1134_p4 }
  0x21   : > { %1144 = shalt.err (!%p1141_p12)
}
  0x22   : > { %s1145_s28 = scalar_lea.vmem %s1350_s9, 768  ;;  %s1244_s29 = smov [#allocation2]  }
  0x23   : > { %p1146_p1 = scmp.ne.s32.totalorder %s1350_s9, %s1145_s28  ;;  %s1150_s30 = sshll.u32 %s1244_s29, 4  ;;  %s1151_s30 = int_to_ptr.vmem [resolvable:$false] %s1150_s30 }
  0x24   : > { %s1152_s5 = scalar_lea.vmem %s1151_s30, 1536  ;;  %p1153_p9 = scmp.lt.s32.totalorder %s1350_s9, %s1151_s30 }
  0x25   : > { %p1148_p3 = pnand %p1146_p1, %p1132_p2  ;;  %p1154_p5 = scmp.lt.s32.totalorder %s1152_s5, %s1145_s28 }
  0x27   : > { %p1149_p11 = pneg %p1148_p3  ;;  %p1155_p6 = por %p1154_p5, %p1153_p9 }
  0x29   : > { %p1156_p7 = pnand %p1155_p6, %p1149_p11 }
  0x2b   : > { %1159 = shalt.err (!%p1156_p7)
}
  0x2c   : > { %s1245_s6 = smov 256   ;;  %s1246_s8 = smov 128  }
  0x2d   : > { %s1247_s11 = smov 8   ;;  %p925_p12 = scmp.ge.s32.totalorder %s1242_s17, 1 }
  0x2e   : > { %1047 = dma.hbm_to_vmem [thread:$0]  (!%p1341_p0), %s1348_s7, 768, %s1350_s9, %s1352_s10, %s1245_s6, %s1246_s8, %s1247_s11  }
  0x2f   : > { %p199_p2 = scmp.lt.s32.totalorder %s1242_s17, 3 }
  0x31   : > { %p200_p4 = pnand %p925_p12, %p199_p2 }
  0x32   : > { %s1383_s18 = sand.u32 (!%p200_p4), 1, %s1226_s13  }
  0x33   : > { %203 = sbr.rel (%p200_p4) target bundleno = 343 (0x157), region = 32  ;;  %s206_s21 = scalar_lea.sflag (!%p200_p4), [#allocation3], %s1383_s18 }
  0x34   : > { %s1039_s19 = smul.u32 (!%p200_p4), 48, %s1383_s18 }
  0x36   : > { %s209_s22 = scalar_lea.vmem (!%p200_p4), [#allocation2], %s1039_s19 }
  0x3a   : > { %1213 = dma.done.wait (%p1320_p8), %s206_s21, 768  }
  0x3b   : > { %1215 = vsyncadd (%p1320_p8), %s206_s21, 4294966528  ;;  %v1248_v0 = vmov 0   ;;  %vm329_vm0 = vcmask 1045504   ;;  %v1109_v1 = vld [vmem:[%s209_s22 + $0x14] ss:$8 sps:$4 sm:$0x3f]   ;;  %v682_v26 = vlaneseq }
  0x3c   : > { %368 = vmatprep.mubr.bf16.mxu1 %v1248_v0  ;;  %487 = vmatprep.mubr.bf16.mxu0 %v1248_v0  ;;  %v1111_v2 = vld [vmem:[%s209_s22 + $0x4] ss:$8 sps:$4 sm:$0x3f]   ;;  %v1113_v3 = vld [vmem:[%s209_s22 + $0x10] ss:$8 sps:$4 sm:$0x3f]  }
  0x3d   : > { %944 = vmatprep.subr.msk.bf16.mxu1 %vm329_vm0, %v1109_v1  ;;  %v1114_v4 = vld [vmem:[%s209_s22] ss:$8 sps:$4 sm:$0x3f]   ;;  %955 = vmatprep.subr.msk.bf16.mxu0 %vm329_vm0, %v1111_v2  ;;  %v331_v6 = vsel %vm329_vm0, %v1113_v3, 0  ;;  %vm316_vm1 = vcmask 97280   ;;  %s927_s30 = sshll.u32 %s1234_s15, 1 }
  0x3e   : > { %v1115_v5 = vld [vmem:[%s1537_s0 + $0x4] sm:$0xff]   ;;  %v450_v7 = vsel %vm329_vm0, %v1114_v4, 0  ;;  %337 = vmatpush1.bf16.msra.mxu1 %v331_v6  ;;  %v1120_v12 = vld [vmem:[%s1537_s0 + $0xc] sm:$0xff]   ;;  %v1122_v14 = vld [vmem:[%s1537_s0 + $0x14] sm:$0xff]   ;;  %p248_p8 = scmp.lt.s32.totalorder %s927_s30, 3  ;;  %v683_v27 = vshrl.u32 %v682_v26, 7 }
  0x3f   : > { %456 = vmatpush1.bf16.msra.mxu0 %v450_v7  ;;  %v1116_v8 = vld [vmem:[%s1537_s0] sm:$0xff]   ;;  %1004 = vmatprep.subr.msk.bf16.mxu1 %vm329_vm0, %v1111_v2  ;;  %v1121_v13 = vld [vmem:[%s1537_s0 + $0x8] sm:$0xff]   ;;  %v1125_v17 = vld [vmem:[%s1537_s0 + $0x10] sm:$0xff]   ;;  %s926_s11 = sshll.u32 %s1383_s18, 6  ;;  %s781_s9 = scalar_lea.sflag [#allocation4], %s1383_s18 }
  0x40   : > { %v1117_v9 = vld [vmem:[%s209_s22 + $0x24] ss:$8 sps:$4 sm:$0x3f]   ;;  %v1119_v10 = vld [vmem:[%s209_s22 + $0x20] ss:$8 sps:$4 sm:$0x3f]  }
  0x41   : > { %945 = vmatmul.mubr.msk.bf16.vlgmr.msra.gmra.mrb[0].mxu1 %vm316_vm1, %v1115_v5  ;;  %v586_v11 = vsel %vm329_vm0, %v1119_v10, 0  ;;  %976 = vmatprep.subr.msk.bf16.mxu0 %vm329_vm0, %v1117_v9  ;;  %v1123_v15 = vld [vmem:[%s1537_s0 + $0x8] sm:$0xff]   ;;  %v1124_v16 = vld [vmem:[%s1537_s0 + $0x1c] sm:$0xff]   ;;  %v1126_v18 = vld [vmem:[%s1537_s0 + $0x10] sm:$0xff]   ;;  %s1558_s30 = smov (!%p248_p8, %s927_s30), 3  ;;  %v684_v32 = vsub.s32 0, %v683_v27 }
  0x42   : > { %956 = vmatmul.mubr.msk.bf16.vlgmr.msra.gmra.mrb[0].mxu0 %vm316_vm1, %v1116_v8  ;;  %1005 = vmatpush1.bf16.msra.mxu1 %v450_v7  ;;  %v1127_v19 = vld [vmem:[%s1537_s0 + $0x18] sm:$0xff]   ;;  %v1129_v21 = vld [vmem:[%s1537_s0 + $0x20] sm:$0xff]   ;;  %s250_s8 = scalar_lea.vmem %s1539_s2, %s1558_s30  ;;  %v688_v34 = vsub.s32 1, %v683_v27  ;;  %s1459_s19 = scalar_lea.vmem [#allocation5], %s926_s11 }
  0x43   : > { %592 = vmatpush1.bf16.msra.mxu0 %v586_v11  ;;  %378 = vmatprep.mubr.bf16.mxu1 %v1248_v0  ;;  %v1128_v20 = vld [vmem:[%s1537_s0 + $0x18] sm:$0xff]   ;;  %v680_v33 = vld [vmem:[%s250_s8] sm:$0x3]  ;;  %s799_s21 = sshll.u32 %s1459_s19, 4  ;;  %s1003_s22 = sshll.u32 %s1234_s15, 7  ;;  %s1480_s21 = int_to_ptr.vmem [resolvable:$true] %s799_s21 }
  0x44   : > { %497 = vmatprep.mubr.bf16.mxu0 %v1248_v0  ;;  %v1450_v35 = vrot.slane %v680_v33, %v684_v32  ;;  %v1452_v37 = vrot.slane %v680_v33, %v688_v34  ;;  %s1486_s24 = scalar_lea.hbm %s1540_s3, %s1003_s22  ;;  %s1160_s15 = scalar_lea.vmem %s1480_s21, 1024 }
  0x45   : > { %p1161_p9 = scmp.ne.s32.totalorder %s1480_s21, %s1160_s15  ;;  %p1547_p11 = scmp.ne.s32.totalorder %s1544_s25, 0 }
  0x46   : > { %s1249_s10 = smov [#allocation5]  }
  0x47   : > { %p1162_p0 = pnand %p1161_p9, %p1547_p11  ;;  %s1164_s23 = sshll.u32 %s1249_s10, 4  ;;  %s1165_s23 = int_to_ptr.vmem [resolvable:$false] %s1164_s23 }
  0x48   : > { %s1166_s28 = scalar_lea.vmem %s1165_s23, 2048  ;;  %p1167_p13 = scmp.lt.s32.totalorder %s1480_s21, %s1165_s23 }
  0x49   : > { %946 = vmatmul.mubr.msk.bf16.gmra.mrb[4].mxu1 %vm316_vm1, %v1120_v12  ;;  %p1163_p10 = pneg %p1162_p0  ;;  %p1168_p1 = scmp.lt.s32.totalorder %s1166_s28, %s1160_s15 }
  0x4a   : > { %957 = vmatmul.mubr.msk.bf16.gmra.mrb[4].mxu0 %vm316_vm1, %v1121_v13  ;;  %388 = vmatprep.mubr.bf16.mxu1 %v1248_v0 }
  0x4b   : > { %623 = vmatprep.mubr.bf16.mxu0 %v1248_v0  ;;  %p1169_p3 = por %p1168_p1, %p1167_p13 }
  0x4d   : > { %p1170_p5 = pnand %p1169_p3, %p1163_p10 }
  0x51   : > { %947 = vmatmul.mubr.msk.bf16.gmra.mrb[8].mxu1 %vm316_vm1, %v1122_v14 }
  0x52   : > { %977 = vmatmul.mubr.msk.bf16.vlgmr.msra.gmra.mrb[0].mxu0 %vm316_vm1, %v1123_v15  ;;  %398 = vmatprep.mubr.bf16.mxu1 %v1248_v0 }
  0x53   : > { %633 = vmatprep.mubr.bf16.mxu0 %v1248_v0 }
  0x59   : > { %948 = vmatmul.mubr.msk.bf16.gmra.mrb[12].mxu1 %vm316_vm1, %v1124_v16 }
  0x5a   : > { %978 = vmatmul.mubr.msk.bf16.gmra.mrb[4].mxu0 %vm316_vm1, %v1125_v17  ;;  %507 = vmatprep.mubr.bf16.mxu1 %v1248_v0 }
  0x5b   : > { %643 = vmatprep.mubr.bf16.mxu0 %v1248_v0 }
  0x61   : > { %958 = vmatmul.mubr.msk.bf16.vlgmr.msra.gmra.mrb[8].mxu1 %vm316_vm1, %v1126_v18 }
  0x62   : > { %979 = vmatmul.mubr.msk.bf16.gmra.mrb[8].mxu0 %vm316_vm1, %v1127_v19  ;;  %517 = vmatprep.mubr.bf16.mxu1 %v1248_v0 }
  0x63   : > { %653 = vmatprep.mubr.bf16.mxu0 %v1248_v0 }
  0x69   : > { %959 = vmatmul.mubr.msk.bf16.gmra.mrb[12].mxu1 %vm316_vm1, %v1128_v20 }
  0x6a   : > { %980 = vmatmul.mubr.msk.bf16.gmra.mrb[12].mxu0 %vm316_vm1, %v1129_v21 }
 0x114   : > { %v370_v22 = vpop.f32.mrb[0].mxu1 }
 0x115   : > { %v372_v23 = vpop.f32.mrb[1].mxu1 }
 0x116   : > { %v374_v24 = vpop.f32.mrb[2].mxu1 }
 0x117   : > { %v376_v25 = vpop.f32.mrb[3].mxu1 }
 0x11c   : > { %v380_v28 = vpop.f32.mrb[4].mxu1 }
 0x11d   : > { %v382_v29 = vpop.f32.mrb[5].mxu1 }
 0x11e   : > { %v384_v30 = vpop.f32.mrb[6].mxu1 }
 0x11f   : > { %v386_v31 = vpop.f32.mrb[7].mxu1 }
 0x125   : > { %v625_v36 = vpop.f32.mrb[0].mxu0 }
 0x126   : > { %v1006_v38 = vadd.f32 %v625_v36, %v370_v22  ;;  %v627_v39 = vpop.f32.mrb[1].mxu0 }
 0x127   : > { %v1007_v40 = vadd.f32 %v627_v39, %v372_v23  ;;  %v629_v41 = vpop.f32.mrb[2].mxu0 }
 0x128   : > { %v692_v42 = vadd.f32 %v1006_v38, %v1450_v35  ;;  %v1008_v43 = vadd.f32 %v629_v41, %v374_v24  ;;  %v631_v44 = vpop.f32.mrb[3].mxu0 }
 0x129   : > { %v693_v45 = vadd.f32 %v1007_v40, %v1452_v37  ;;  %v1009_v46 = vadd.f32 %v631_v44, %v376_v25 }
 0x12a   : > { %v694_v47 = vadd.f32 %v1008_v43, %v1450_v35 }
 0x12b   : > { %v995_v48 = vpack.c.bf16 %v693_v45, %v692_v42  ;;  %v695_v49 = vadd.f32 %v1009_v46, %v1452_v37 }
 0x12d   : > { %772 = vst [vmem:[%s1459_s19] sm:$0xff] %v995_v48  ;;  %v996_v50 = vpack.c.bf16 %v695_v49, %v694_v47  ;;  %v635_v51 = vpop.f32.mrb[4].mxu0 }
 0x12e   : > { %v1010_v52 = vadd.f32 %v635_v51, %v380_v28  ;;  %v637_v53 = vpop.f32.mrb[5].mxu0 }
 0x12f   : > { %773 = vst [vmem:[%s1459_s19 + $0x8] sm:$0xff] %v996_v50  ;;  %v1011_v54 = vadd.f32 %v637_v53, %v382_v29  ;;  %v639_v55 = vpop.f32.mrb[6].mxu0 }
 0x130   : > { %v696_v56 = vadd.f32 %v1010_v52, %v1450_v35  ;;  %v1012_v57 = vadd.f32 %v639_v55, %v384_v30  ;;  %v641_v58 = vpop.f32.mrb[7].mxu0 }
 0x131   : > { %v697_v59 = vadd.f32 %v1011_v54, %v1452_v37  ;;  %v1013_v60 = vadd.f32 %v641_v58, %v386_v31 }
 0x132   : > { %v698_v61 = vadd.f32 %v1012_v57, %v1450_v35 }
 0x133   : > { %v997_v62 = vpack.c.bf16 %v697_v59, %v696_v56  ;;  %v699_v63 = vadd.f32 %v1013_v60, %v1452_v37 }
 0x134   : > { %v509_v1 = vpop.f32.mrb[8].mxu1 }
 0x135   : > { %774 = vst [vmem:[%s1459_s19 + $0x10] sm:$0xff] %v997_v62  ;;  %v998_v0 = vpack.c.bf16 %v699_v63, %v698_v61  ;;  %v645_v2 = vpop.f32.mrb[8].mxu0  ;;  %v511_v4 = vpop.f32.mrb[9].mxu1 }
 0x136   : > { %v1014_v3 = vadd.f32 %v645_v2, %v509_v1  ;;  %v647_v5 = vpop.f32.mrb[9].mxu0  ;;  %v513_v7 = vpop.f32.mrb[10].mxu1 }
 0x137   : > { %775 = vst [vmem:[%s1459_s19 + $0x18] sm:$0xff] %v998_v0  ;;  %v1015_v6 = vadd.f32 %v647_v5, %v511_v4  ;;  %v649_v8 = vpop.f32.mrb[10].mxu0  ;;  %v515_v11 = vpop.f32.mrb[11].mxu1 }
 0x138   : > { %v700_v9 = vadd.f32 %v1014_v3, %v1450_v35  ;;  %v1016_v10 = vadd.f32 %v649_v8, %v513_v7  ;;  %v651_v12 = vpop.f32.mrb[11].mxu0 }
 0x139   : > { %v701_v13 = vadd.f32 %v1015_v6, %v1452_v37  ;;  %v1017_v14 = vadd.f32 %v651_v12, %v515_v11 }
 0x13a   : > { %v702_v15 = vadd.f32 %v1016_v10, %v1450_v35 }
 0x13b   : > { %v999_v16 = vpack.c.bf16 %v701_v13, %v700_v9  ;;  %v703_v17 = vadd.f32 %v1017_v14, %v1452_v37 }
 0x13c   : > { %v519_v19 = vpop.f32.mrb[12].mxu1 }
 0x13d   : > { %776 = vst [vmem:[%s1459_s19 + $0x20] sm:$0xff] %v999_v16  ;;  %v1000_v18 = vpack.c.bf16 %v703_v17, %v702_v15  ;;  %v655_v20 = vpop.f32.mrb[12].mxu0  ;;  %v521_v22 = vpop.f32.mrb[13].mxu1 }
 0x13e   : > { %v1018_v21 = vadd.f32 %v655_v20, %v519_v19  ;;  %v657_v23 = vpop.f32.mrb[13].mxu0  ;;  %v523_v25 = vpop.f32.mrb[14].mxu1 }
 0x13f   : > { %777 = vst [vmem:[%s1459_s19 + $0x28] sm:$0xff] %v1000_v18  ;;  %v1019_v24 = vadd.f32 %v657_v23, %v521_v22  ;;  %v659_v26 = vpop.f32.mrb[14].mxu0  ;;  %v525_v29 = vpop.f32.mrb[15].mxu1 }
 0x140   : > { %v704_v27 = vadd.f32 %v1018_v21, %v1450_v35  ;;  %v1020_v28 = vadd.f32 %v659_v26, %v523_v25  ;;  %v661_v30 = vpop.f32.mrb[15].mxu0 }
 0x141   : > { %v705_v31 = vadd.f32 %v1019_v24, %v1452_v37  ;;  %v1021_v32 = vadd.f32 %v661_v30, %v525_v29 }
 0x142   : > { %v706_v33 = vadd.f32 %v1020_v28, %v1450_v35 }
 0x143   : > { %v1001_v34 = vpack.c.bf16 %v705_v31, %v704_v27  ;;  %v707_v36 = vadd.f32 %v1021_v32, %v1452_v37 }
 0x145   : > { %778 = vst [vmem:[%s1459_s19 + $0x30] sm:$0xff] %v1001_v34  ;;  %v1002_v38 = vpack.c.bf16 %v707_v36, %v706_v33 }
 0x147   : > { %779 = vst [vmem:[%s1459_s19 + $0x38] sm:$0xff] %v1002_v38 }
 0x148   : > { %1173 = shalt.err (!%p1170_p5)
}
 0x149   : > { %s1174_s29 = scalar_lea.hbm %s1486_s24, 1024  ;;  %s1178_s6 = scalar_lea.hbm %s1540_s3, 2048 }
 0x14a   : > { %p1175_p6 = scmp.ne.s32.totalorder %s1486_s24, %s1174_s29  ;;  %p1179_p2 = scmp.lt.u32.totalorder %s1486_s24, %s1540_s3 }
 0x14b   : > { %p1180_p4 = scmp.lt.u32.totalorder %s1178_s6, %s1174_s29  ;;  %p1182_p9 = scmp.lt.u32.totalorder %s1174_s29, %s1486_s24 }
 0x14c   : > { %p1176_p7 = pnand %p1175_p6, %p1547_p11 }
 0x14d   : > { %p1181_p8 = por %p1180_p4, %p1179_p2 }
 0x14e   : > { %p1177_p12 = pneg %p1176_p7 }
 0x14f   : > { %p1183_p0 = por %p1182_p9, %p1181_p8 }
 0x151   : > { %p1184_p10 = pnand %p1183_p0, %p1177_p12 }
 0x153   : > { %1187 = shalt.err (!%p1184_p10)
}
 0x154   : > { %s1250_s19 = smov 128   ;;  %s1251_s22 = smov 256  }
 0x155   : > { %s1252_s4 = smov 8  }
 0x156   : > { %1042 = dma.vmem_to_hbm [thread:$0]  (%p1547_p11), %s1480_s21, 1024, %s1486_s24, %s781_s9, %s1250_s19, %s1251_s22, %s1252_s4  }
 0x157 PF: > { %s814_s7 = sand.u32 1, %s1222_s12   ;;  %p1548_p13 = scmp.ne.s32.totalorder %s1545_s27, 0 }
 0x158   : > { %p1549_p1 = scmp.ge.s32.totalorder %s1242_s17, 2  ;;  %s815_s15 = scalar_lea.sflag [#allocation4], %s814_s7 }
 0x15a   : > { %p1049_p3 = pnand %p1549_p1, %p1548_p13 }
 0x15c   : > { %1217 = dma.done.wait (!%p1049_p3), %s815_s15, 1024  }
 0x15d   : > { %1219 = vsyncadd (!%p1049_p3), %s815_s15, 4294966272  ;;  %s19_s17 = sadd.s32 1, %s1242_s17   ;;  %s1550_s12 = smov %s1226_s13 }
 0x15e   : > { %p16_p5 = scmp.ge.s32.totalorder %s19_s17, 4   ;;  %s1551_s13 = smov %s1230_s14 }
 0x15f   : > { %s1552_s14 = smov %s1329_s26  ;;  %s1553_s15 = smov %s1238_s16 }
 0x160   : > { %s1554_s16 = smov %s1556_s20  ;;  %18 = sbr.rel (!%p16_p5) target bundleno = 6 (0x6), region = 88 }
 0x167   :  { %820 = vsyncpa [#allocation3], 1 }
 0x168   :  { %822 = vsyncpa [#allocation3 + $0x1], 1 }
 0x169   :  { %823 = vsyncpa [#allocation4], 1 }
 0x16a   :  { %825 = vsyncpa [#allocation4 + $0x1], 1 }

</bundles_post_ra>
